<compile_context>
chip_gen: v7x
topology: tpu7x:2x2x1
jax: 0.10.0
libtpu: 0.0.40
codegen_flags: <defaults>
</compile_context>

<pallas_src>
import jax
import jax.numpy as jnp
from jax.experimental import pallas as pl
from jax.experimental.pallas import tpu as pltpu


def _round_up(x, m):
    return ((x + m - 1) // m) * m


def mlp_kernel(x_ref, w1_ref, b1_ref, w2_ref, b2_ref, w3_ref, b3_ref, o_ref):
    # Layer 1: cast x to bf16 in-kernel (no wrapper pre-pass); bf16 MXU matmul, f32 acc.
    x = x_ref[...].astype(jnp.bfloat16)
    h1 = jnp.dot(x, w1_ref[...], preferred_element_type=jnp.float32)
    h1 = jnp.maximum(h1 + b1_ref[...], 0.0)
    # Layer 2
    h2 = jnp.dot(h1.astype(jnp.bfloat16), w2_ref[...],
                 preferred_element_type=jnp.float32)
    h2 = jnp.maximum(h2 + b2_ref[...], 0.0)
    # Layer 3: logits at logical num_classes width (masked store, 32x fewer output
    # bytes than a 128-padded f32 slab).
    o_ref[...] = (jnp.dot(h2.astype(jnp.bfloat16), w3_ref[...],
                          preferred_element_type=jnp.float32)
                  + b3_ref[...]).astype(o_ref.dtype)


def prepare_params(params):
    """One-time weight prep: bf16 cast + zero-pad the hidden dim to 128.

    Hoisted out of the per-call path (weights are invariant across forward calls).
    """
    w1, b1, w2, b2, w3, b3 = params
    input_size, hidden_size = w1.shape
    num_classes = w3.shape[1]
    hid_p = _round_up(hidden_size, 128)

    def pad2(a, rows, cols, dtype):
        a = a.astype(dtype)
        return jnp.pad(a, ((0, rows - a.shape[0]), (0, cols - a.shape[1])))

    # TODO(synk): on v7x only, e4m3 fp8 weights would halve resident-weight VMEM/DMA for
    # a TF-IDF-scale w1; keep bf16 here since v5e/v6e MXUs have no fp8 path.
    w1_p = pad2(w1, input_size, hid_p, jnp.bfloat16)   # K (input) unpadded, N -> 128
    w2_p = pad2(w2, hid_p, hid_p, jnp.bfloat16)
    w3_p = pad2(w3, hid_p, num_classes, jnp.bfloat16)  # N (classes) kept at logical width
    b1_p = pad2(b1, 1, hid_p, jnp.float32)
    b2_p = pad2(b2, 1, hid_p, jnp.float32)
    b3_p = b3.astype(jnp.float32)                      # (1, num_classes)
    return (w1_p, b1_p, w2_p, b2_p, w3_p, b3_p)


def _choose_batch_tile(batch, batch_tile):
    tb = _round_up(min(batch, batch_tile), 8)
    if batch > 8:
        # Guarantee >= 2 grid steps so dimension_semantics=("parallel",) can shard the
        # batch across v7x's two TensorCores (and keep them load-balanced).
        tb = min(tb, _round_up(pl.cdiv(batch, 2), 8))
    return max(tb, 8)


def news_classifier_forward(x, prepared_params, *, batch_tile=1024):
    """Fused 3-layer MLP forward in one batch-tiled Pallas kernel.

    `prepared_params` must come from prepare_params().
    """
    w1_p, b1_p, w2_p, b2_p, w3_p, b3_p = prepared_params
    batch, input_size = x.shape
    hid_p = w1_p.shape[1]
    num_classes = w3_p.shape[1]

    tb = _choose_batch_tile(batch, batch_tile)
    grid = (pl.cdiv(batch, tb),)   # ragged last block: OOB rows are masked on store

    # Constant-index weights/biases: VMEM-resident, single-buffered (no re-DMA).
    const_kw = dict(pipeline_mode=pl.Buffered(1))

    # Explicit scoped-VMEM limit with headroom (v5e default is only 16 MiB).
    weight_bytes = 2 * (w1_p.size + w2_p.size + w3_p.size) \
        + 4 * (b1_p.size + b2_p.size + b3_p.size)
    stream_bytes = 2 * (tb * input_size * 4 + tb * num_classes * 4)   # dbl-buffered x/out
    live_bytes = 2 * tb * hid_p * 4                                   # h1/h2 activations
    vmem_limit = int(min(max(32 * 1024 * 1024,
                             2 * (weight_bytes + stream_bytes + live_bytes)),
                         64 * 1024 * 1024))

    flops = 2 * batch * (input_size * hid_p + hid_p * hid_p + hid_p * num_classes)
    bytes_accessed = (4 * batch * input_size        # f32 x
                      + weight_bytes                # resident params
                      + 4 * batch * num_classes)    # f32 logits

    # TODO(synk): if input_size grows to TF-IDF scale (input_size*hid_p*2B beyond ~8 MiB
    # on v5e / ~16 MiB on v7x / ~24 MiB on v6e), add a trailing grid axis over layer-1 K:
    # tile x as (tb, tk) and w1 as (tk, hid_p), accumulate h1 into an f32 VMEM scratch,
    # and run layers 2/3 + the store under pl.when(k == pl.num_programs(1) - 1) with
    # dimension_semantics ("parallel", "arbitrary").
    out = pl.pallas_call(
        mlp_kernel,
        out_shape=jax.ShapeDtypeStruct((batch, num_classes), jnp.float32),
        grid=grid,
        in_specs=[
            pl.BlockSpec((tb, input_size), lambda i: (i, 0)),                  # x
            pl.BlockSpec((input_size, hid_p), lambda i: (0, 0), **const_kw),   # w1
            pl.BlockSpec((1, hid_p), lambda i: (0, 0), **const_kw),            # b1
            pl.BlockSpec((hid_p, hid_p), lambda i: (0, 0), **const_kw),        # w2
            pl.BlockSpec((1, hid_p), lambda i: (0, 0), **const_kw),            # b2
            pl.BlockSpec((hid_p, num_classes), lambda i: (0, 0), **const_kw),  # w3
            pl.BlockSpec((1, num_classes), lambda i: (0, 0), **const_kw),      # b3
        ],
        out_specs=pl.BlockSpec((tb, num_classes), lambda i: (i, 0)),
        compiler_params=pltpu.CompilerParams(
            dimension_semantics=("parallel",),
            vmem_limit_bytes=vmem_limit),
        cost_estimate=pl.CostEstimate(
            flops=flops, transcendentals=0, bytes_accessed=bytes_accessed),
    )(x, w1_p, b1_p, w2_p, b2_p, w3_p, b3_p)
    return out


def init_params(key, input_size, hidden_size, num_classes):
    """Deterministic PyTorch-Linear-style init; weights stored as (in, out)."""
    ks = jax.random.split(key, 6)

    def linear(kw, kb, fan_in, fan_out):
        bound = 1.0 / jnp.sqrt(fan_in)
        w = jax.random.uniform(kw, (fan_in, fan_out), jnp.float32, -bound, bound)
        b = jax.random.uniform(kb, (1, fan_out), jnp.float32, -bound, bound)
        return w, b

    w1, b1 = linear(ks[0], ks[1], input_size, hidden_size)
    w2, b2 = linear(ks[2], ks[3], hidden_size, hidden_size)
    w3, b3 = linear(ks[4], ks[5], hidden_size, num_classes)
    return (w1, b1, w2, b2, w3, b3)


def reference_forward(x, params):
    """Plain JAX f32 reference of NewsClassifier.forward."""
    w1, b1, w2, b2, w3, b3 = params
    h1 = jnp.maximum(x @ w1 + b1, 0.0)
    h2 = jnp.maximum(h1 @ w2 + b2, 0.0)
    return h2 @ w3 + b3


if __name__ == "__main__":
    # Small shapes consistent with the module; batch chosen ragged (not a tile multiple)
    # to exercise the masked partial last block and the >= 2-step parallel grid.
    batch, input_size, hidden_size, num_classes = 50, 16, 32, 4

    key = jax.random.PRNGKey(0)
    k_x, k_p = jax.random.split(key)
    x = jax.random.normal(k_x, (batch, input_size), dtype=jnp.float32)
    params = init_params(k_p, input_size, hidden_size, num_classes)

    # One-time weight prep (hoisted out of the per-call path), then a jitted forward.
    prepared = jax.block_until_ready(prepare_params(params))
    fwd = jax.jit(news_classifier_forward)

    out = jax.block_until_ready(fwd(x, prepared))

    ref = reference_forward(x, params)
    assert out.shape == (batch, num_classes)
    # bf16 MXU inputs with f32 accumulation: loosened tolerance vs. the f32 reference.
    assert jnp.allclose(out, ref, atol=2e-2, rtol=2e-2), "Pallas output mismatch vs reference"

    print("KERNEL_OK")
</pallas_src>

<mosaic_0001>
module attributes {stable_mosaic.version = 11 : i64} {
  func.func @mlp_kernel(%arg0: i32, %arg1: memref<32x16xf32, #tpu.memory_space<vmem>>, %arg2: memref<16x128xbf16, #tpu.memory_space<vmem>>, %arg3: memref<1x128xf32, #tpu.memory_space<vmem>>, %arg4: memref<128x128xbf16, #tpu.memory_space<vmem>>, %arg5: memref<1x128xf32, #tpu.memory_space<vmem>>, %arg6: memref<128x4xbf16, #tpu.memory_space<vmem>>, %arg7: memref<1x4xf32, #tpu.memory_space<vmem>>, %arg8: memref<32x4xf32, #tpu.memory_space<vmem>>) attributes {dimension_semantics = [#tpu.dimension_semantics<parallel>], iteration_bounds = array<i64: 2>, scalar_prefetch = 0 : i64, scratch_operands = 0 : i64, tpu.core_type = #tpu.core_type<tc>, window_params = [{transform_indices = @transform_0, window_bounds = array<i64: 32, 16>}, {pipeline_mode = #tpu.pipeline_mode<synchronous>, transform_indices = @transform_1, window_bounds = array<i64: 16, 128>}, {pipeline_mode = #tpu.pipeline_mode<synchronous>, transform_indices = @transform_2, window_bounds = array<i64: 1, 128>}, {pipeline_mode = #tpu.pipeline_mode<synchronous>, transform_indices = @transform_3, window_bounds = array<i64: 128, 128>}, {pipeline_mode = #tpu.pipeline_mode<synchronous>, transform_indices = @transform_4, window_bounds = array<i64: 1, 128>}, {pipeline_mode = #tpu.pipeline_mode<synchronous>, transform_indices = @transform_5, window_bounds = array<i64: 128, 4>}, {pipeline_mode = #tpu.pipeline_mode<synchronous>, transform_indices = @transform_6, window_bounds = array<i64: 1, 4>}, {transform_indices = @transform_7, window_bounds = array<i64: 32, 4>}]} {
    %c0 = arith.constant 0 : index
    %c0_0 = arith.constant 0 : index
    %0 = vector.load %arg1[%c0, %c0_0] : memref<32x16xf32, #tpu.memory_space<vmem>>, vector<32x16xf32>
    %1 = arith.truncf %0 : vector<32x16xf32> to vector<32x16xbf16>
    %c0_1 = arith.constant 0 : index
    %c0_2 = arith.constant 0 : index
    %2 = vector.load %arg2[%c0_1, %c0_2] : memref<16x128xbf16, #tpu.memory_space<vmem>>, vector<16x128xbf16>
    %cst = arith.constant dense<0.000000e+00> : vector<32x128xf32>
    %3 = tpu.matmul %1, %2, %cst {dimension_numbers = #tpu.dot_dimension_numbers<[1], [0], [0], [1], [0, 0, 1, 1], [], []>} : vector<32x16xbf16>, vector<16x128xbf16>, vector<32x128xf32> -> vector<32x128xf32>
    %c0_3 = arith.constant 0 : index
    %c0_4 = arith.constant 0 : index
    %4 = vector.load %arg3[%c0_3, %c0_4] : memref<1x128xf32, #tpu.memory_space<vmem>>, vector<1x128xf32>
    %5 = vector.broadcast %4 : vector<1x128xf32> to vector<32x128xf32>
    %6 = arith.addf %3, %5 : vector<32x128xf32>
    %cst_5 = arith.constant 0.000000e+00 : f32
    %7 = vector.broadcast %cst_5 : f32 to vector<32x128xf32>
    %8 = arith.maximumf %6, %7 : vector<32x128xf32>
    %9 = arith.truncf %8 : vector<32x128xf32> to vector<32x128xbf16>
    %c0_6 = arith.constant 0 : index
    %c0_7 = arith.constant 0 : index
    %10 = vector.load %arg4[%c0_6, %c0_7] : memref<128x128xbf16, #tpu.memory_space<vmem>>, vector<128x128xbf16>
    %cst_8 = arith.constant dense<0.000000e+00> : vector<32x128xf32>
    %11 = tpu.matmul %9, %10, %cst_8 {dimension_numbers = #tpu.dot_dimension_numbers<[1], [0], [0], [1], [0, 0, 1, 1], [], []>} : vector<32x128xbf16>, vector<128x128xbf16>, vector<32x128xf32> -> vector<32x128xf32>
    %c0_9 = arith.constant 0 : index
    %c0_10 = arith.constant 0 : index
    %12 = vector.load %arg5[%c0_9, %c0_10] : memref<1x128xf32, #tpu.memory_space<vmem>>, vector<1x128xf32>
    %13 = vector.broadcast %12 : vector<1x128xf32> to vector<32x128xf32>
    %14 = arith.addf %11, %13 : vector<32x128xf32>
    %cst_11 = arith.constant 0.000000e+00 : f32
    %15 = vector.broadcast %cst_11 : f32 to vector<32x128xf32>
    %16 = arith.maximumf %14, %15 : vector<32x128xf32>
    %17 = arith.truncf %16 : vector<32x128xf32> to vector<32x128xbf16>
    %c0_12 = arith.constant 0 : index
    %c0_13 = arith.constant 0 : index
    %18 = vector.load %arg6[%c0_12, %c0_13] : memref<128x4xbf16, #tpu.memory_space<vmem>>, vector<128x4xbf16>
    %cst_14 = arith.constant dense<0.000000e+00> : vector<32x4xf32>
    %19 = tpu.matmul %17, %18, %cst_14 {dimension_numbers = #tpu.dot_dimension_numbers<[1], [0], [0], [1], [0, 0, 1, 1], [], []>} : vector<32x128xbf16>, vector<128x4xbf16>, vector<32x4xf32> -> vector<32x4xf32>
    %c0_15 = arith.constant 0 : index
    %c0_16 = arith.constant 0 : index
    %20 = vector.load %arg7[%c0_15, %c0_16] : memref<1x4xf32, #tpu.memory_space<vmem>>, vector<1x4xf32>
    %21 = vector.broadcast %20 : vector<1x4xf32> to vector<32x4xf32>
    %22 = arith.addf %19, %21 : vector<32x4xf32>
    %c0_17 = arith.constant 0 : index
    %c0_18 = arith.constant 0 : index
    %23 = vector.load %arg8[%c0_17, %c0_18] : memref<32x4xf32, #tpu.memory_space<vmem>>, vector<32x4xf32>
    tpu.vector_store %arg8[%c0_17, %c0_18], %22 {strides = array<i32>} : memref<32x4xf32, #tpu.memory_space<vmem>>, vector<32x4xf32>,
    return
  }
  func.func @transform_0(%arg0: i32) -> (i32, i32) {
    %c0_i32 = arith.constant 0 : i32
    %c0_i32_0 = arith.constant 0 : i32
    return %arg0, %c0_i32 : i32, i32
  }
  func.func @transform_1(%arg0: i32) -> (i32, i32) {
    %c0_i32 = arith.constant 0 : i32
    %c0_i32_0 = arith.constant 0 : i32
    %c0_i32_1 = arith.constant 0 : i32
    return %c0_i32, %c0_i32_0 : i32, i32
  }
  func.func @transform_2(%arg0: i32) -> (i32, i32) {
    %c0_i32 = arith.constant 0 : i32
    %c0_i32_0 = arith.constant 0 : i32
    %c0_i32_1 = arith.constant 0 : i32
    return %c0_i32, %c0_i32_0 : i32, i32
  }
  func.func @transform_3(%arg0: i32) -> (i32, i32) {
    %c0_i32 = arith.constant 0 : i32
    %c0_i32_0 = arith.constant 0 : i32
    %c0_i32_1 = arith.constant 0 : i32
    return %c0_i32, %c0_i32_0 : i32, i32
  }
  func.func @transform_4(%arg0: i32) -> (i32, i32) {
    %c0_i32 = arith.constant 0 : i32
    %c0_i32_0 = arith.constant 0 : i32
    %c0_i32_1 = arith.constant 0 : i32
    return %c0_i32, %c0_i32_0 : i32, i32
  }
  func.func @transform_5(%arg0: i32) -> (i32, i32) {
    %c0_i32 = arith.constant 0 : i32
    %c0_i32_0 = arith.constant 0 : i32
    %c0_i32_1 = arith.constant 0 : i32
    return %c0_i32, %c0_i32_0 : i32, i32
  }
  func.func @transform_6(%arg0: i32) -> (i32, i32) {
    %c0_i32 = arith.constant 0 : i32
    %c0_i32_0 = arith.constant 0 : i32
    %c0_i32_1 = arith.constant 0 : i32
    return %c0_i32, %c0_i32_0 : i32, i32
  }
  func.func @transform_7(%arg0: i32) -> (i32, i32) {
    %c0_i32 = arith.constant 0 : i32
    %c0_i32_0 = arith.constant 0 : i32
    return %arg0, %c0_i32 : i32, i32
  }
}

</mosaic_0001>

<bundles_post_ra>
// kernel: news_classifier_forward.1
= control target key start
LH: loop header
LB: loop body
LE: loop exit
PB: predicated region body
PF: predicated region fallthrough
CT: control target
= control target key end

     0   :  { %s1213_s24 = smov 0   ;;  %s1215_s25 = smov 0   ;;  %s1373_s0 = inlined_call_operand.vmem [shape: f32[50,16], index: 0, kind: input, shape index: {}]   ;;  %s1374_s1 = inlined_call_operand.vmem [shape: bf16[16,128], index: 1, kind: input, shape index: {}]   ;;  %s1375_s2 = inlined_call_operand.vmem [shape: f32[1,128], index: 2, kind: input, shape index: {}]   ;;  %s1376_s3 = inlined_call_operand.vmem [shape: bf16[128,128], index: 3, kind: input, shape index: {}]   ;;  %s1377_s4 = inlined_call_operand.vmem [shape: f32[1,128], index: 4, kind: input, shape index: {}]   ;;  %s1378_s5 = inlined_call_operand.vmem [shape: bf16[128,4], index: 5, kind: input, shape index: {}]   ;;  %s1379_s6 = inlined_call_operand.vmem [shape: f32[1,4], index: 6, kind: input, shape index: {}]   ;;  %s1380_s7 = inlined_call_operand.vmem [shape: f32[50,4], index: 7, kind: output, shape index: {}]  }
   0x1   :  { %s1217_s26 = smov 0  }
   0x2 LB: > { %s1226_s27 = sadd.s32 4294967295, %s1139_s26   ;;  %s1228_s28 = sadd.s32 1, %s1139_s26   ;;  %s1139_s26 = sphi %s1217_s26, %s1387_s26   ;;  %s1135_s25 = sphi %s1215_s25, %s1386_s25   ;;  %s1131_s24 = sphi %s1213_s24, %s1385_s24  }
   0x3   : > { %s173_s29 = ssub.s32 %s1139_s26, %s1228_s28  ;;  %s176_s30 = sadd.s32 1, %s1135_s25 }
   0x4   : > { %p174_p0 = scmp.eq.s32.totalorder %s173_s29, 0  ;;  %p186_p1 = scmp.ne.s32.totalorder %s1135_s25, %s1131_s24 }
   0x5   : > { %p187_p2 = scmp.eq.s32.totalorder %s1226_s27, 1  ;;  %p865_p3 = scmp.ge.s32.totalorder %s1139_s26, 1 }
   0x6   : > { %s1236_s8 = scalar_select %p174_p0, %s1135_s25, %s176_s30  }
   0x7   : > { %p1238_p4 = por %p187_p2, %p186_p1  ;;  %p246_p5 = scmp.lt.s32.totalorder %s1139_s26, 3 }
   0x9   : > { %p247_p6 = pnand %p865_p3, %p246_p5 }
   0xa   : > { %v1068_v0 = vld [vmem:[%s1374_s1] sm:$0xff] (!%p247_p6)   ;;  %s1246_s12 = sshll.u32 (!%p247_p6), %s1226_s27, 2  ;;  %v1070_v2 = vld [vmem:[%s1376_s3 + $0x8] sm:$0xff] (!%p247_p6)   ;;  %v1071_v3 = vld [vmem:[%s1376_s3 + $0x10] sm:$0xff] (!%p247_p6)   ;;  %vm322_vm0 = vcmask (!%p247_p6), 130048   ;;  %s278_s22 = sand.u32 (!%p247_p6), 1, %s1131_s24  }
   0xb   : > { %250 = sbr.rel (%p247_p6) target bundleno = 737 (0x2e1), region = 48  ;;  %p286_p7 = scmp.lt.s32.totalorder (!%p247_p6), %s1246_s12, 6  ;;  %934 = vmatprep.subr.bf16.mxu0 (!%p247_p6), %v1068_v0  ;;  %v1069_v1 = vld [vmem:[%s1376_s3] sm:$0xff] (!%p247_p6)   ;;  %v1072_v9 = vld [vmem:[%s1376_s3 + $0x18] sm:$0xff] (!%p247_p6)   ;;  %v1074_v12 = vld [vmem:[%s1376_s3 + $0x28] sm:$0xff] (!%p247_p6)   ;;  %vm630_vm1 = vcmask (!%p247_p6), 31744  }
   0xc   : > { %935 = vmatpush3.bf16.msra.mxu0 (!%p247_p6), %v1068_v0  ;;  %940 = vmatprep.subr.bf16.mxu1 (!%p247_p6), %v1069_v1  ;;  %v1073_v11 = vld [vmem:[%s1376_s3 + $0x20] sm:$0xff] (!%p247_p6)   ;;  %v1075_v13 = vld [vmem:[%s1376_s3 + $0x30] sm:$0xff] (!%p247_p6)   ;;  %v1076_v14 = vld [vmem:[%s1376_s3 + $0x38] sm:$0xff] (!%p247_p6)   ;;  %s866_s23 = sshll.u32 (!%p247_p6), %s278_s22, 5 }
   0xd   : > { %941 = vmatpush3.bf16.msra.mxu1 (!%p247_p6), %v1069_v1  ;;  %v1077_v15 = vld [vmem:[%s1378_s5] sm:$0xff] (!%p247_p6)   ;;  %v1078_v16 = vld [vmem:[%s1378_s5 + $0x8] sm:$0xff] (!%p247_p6)   ;;  %v1079_v17 = vld [vmem:[%s1378_s5 + $0x10] sm:$0xff] (!%p247_p6)   ;;  %s1311_s30 = scalar_lea.vmem (!%p247_p6), [#allocation2], %s866_s23  }
   0xe   : > { %942 = vmatprep.subr.bf16.mxu1 (!%p247_p6), %v1070_v2  ;;  %960 = vmatprep.subr.bf16.mxu0 (!%p247_p6), %v1077_v15  ;;  %v1080_v18 = vld [vmem:[%s1378_s5 + $0x18] sm:$0xff] (!%p247_p6)   ;;  %v1081_v19 = vld [vmem:[%s1378_s5 + $0x20] sm:$0xff] (!%p247_p6)   ;;  %v1082_v20 = vld [vmem:[%s1378_s5 + $0x28] sm:$0xff] (!%p247_p6)  }
   0xf   : > { %v869_v21 = vld [vmem:[%s1375_s2] ss:$0 sm:$0xff] (!%p247_p6)  ;;  %v1083_v36 = vld [vmem:[%s1378_s5 + $0x30] sm:$0xff] (!%p247_p6)   ;;  %v1084_v37 = vld [vmem:[%s1378_s5 + $0x38] sm:$0xff] (!%p247_p6)  }
  0x10   : > { %v873_v38 = vld [vmem:[%s1377_s4] ss:$0 sm:$0xff] (!%p247_p6) }
  0x11   : > { %943 = vmatpush3.bf16.msra.mxu1 (!%p247_p6), %v1070_v2  ;;  %v882_v53 = vld [vmem:[%s1379_s6] ss:$0 sm:$0xff] (!%p247_p6) }
  0x12   : > { %s287_s15 = scalar_select %p286_p7, %s1246_s12, 6  ;;  %944 = vmatprep.subr.bf16.mxu1 %v1071_v3 }
  0x13   : > { %s643_s24 = ssub.s32 (%p1238_p4), 7, %s1246_s12  ;;  %s908_s10 = sshll.u32 (%p1238_p4), %s1226_s27, 5 }
  0x14   : > { %s868_s18 = sshll.u32 %s287_s15, 3  ;;  %p644_p8 = scmp.lt.s32.totalorder (%p1238_p4), %s643_s24, 4 }
  0x15   : > { %s289_s21 = scalar_lea.vmem %s1373_s0, %s868_s18  ;;  %945 = vmatpush3.bf16.msra.mxu1 %v1071_v3  ;;  %s1324_s14 = scalar_lea.vmem (%p1238_p4), %s1380_s7, %s908_s10  }
  0x16   : > { %v301_v4 = vld [vmem:[%s289_s21] sm:$0xff]  ;;  %v302_v5 = vld [vmem:[%s289_s21 + $0x8] sm:$0xff]  ;;  %v303_v6 = vld [vmem:[%s289_s21 + $0x10] sm:$0xff]  ;;  %946 = vmatprep.subr.bf16.mxu1 %v1072_v9 }
  0x17   : > { %v305_v7 = vpack.c.bf16 %v302_v5, %v301_v4  ;;  %v304_v8 = vld [vmem:[%s289_s21 + $0x18] sm:$0xff] }
  0x18   : > { %v306_v10 = vpack.c.bf16 %v304_v8, %v303_v6 }
  0x19   : > { %936 = vmatprep.mubr.msk.bf16.mxu0 %vm322_vm0, %v305_v7  ;;  %947 = vmatpush3.bf16.msra.mxu1 %v1072_v9 }
  0x1a   : > { %937 = vmatmul.mubr.msk.bf16.vlgmr.msra.gmra.mrb[0].mxu0 %vm322_vm0, %v306_v10  ;;  %948 = vmatprep.subr.bf16.mxu1 %v1073_v11 }
  0x1b   : > { %961 = vmatpush3.bf16.msra.mxu0 %v1077_v15 }
  0x1c   : > { %962 = vmatprep.subr.bf16.mxu0 %v1078_v16 }
  0x1d   : > { %949 = vmatpush3.bf16.msra.mxu1 %v1073_v11 }
  0x1e   : > { %950 = vmatprep.subr.bf16.mxu1 %v1074_v12 }
  0x1f   : > { %963 = vmatpush3.bf16.msra.mxu0 %v1078_v16 }
  0x20   : > { %964 = vmatprep.subr.bf16.mxu0 %v1079_v17 }
  0x21   : > { %951 = vmatpush3.bf16.msra.mxu1 %v1074_v12 }
  0x22   : > { %952 = vmatprep.subr.bf16.mxu1 %v1075_v13 }
  0x23   : > { %965 = vmatpush3.bf16.msra.mxu0 %v1079_v17 }
  0x24   : > { %966 = vmatprep.subr.bf16.mxu0 %v1080_v18 }
  0x25   : > { %953 = vmatpush3.bf16.msra.mxu1 %v1075_v13 }
  0x26   : > { %954 = vmatprep.subr.bf16.mxu1 %v1076_v14 }
  0x27   : > { %967 = vmatpush3.bf16.msra.mxu0 %v1080_v18 }
  0x28   : > { %968 = vmatprep.subr.bf16.mxu0 %v1081_v19 }
  0x29   : > { %955 = vmatpush3.bf16.msra.mxu1 %v1076_v14 }
  0x2b   : > { %969 = vmatpush3.bf16.msra.mxu0 %v1081_v19 }
  0x2c   : > { %970 = vmatprep.subr.bf16.mxu0 %v1082_v20 }
  0x2f   : > { %971 = vmatpush3.bf16.msra.mxu0 %v1082_v20 }
  0x30   : > { %972 = vmatprep.subr.bf16.mxu0 %v1083_v36 }
  0x33   : > { %973 = vmatpush3.bf16.msra.mxu0 %v1083_v36 }
  0x34   : > { %974 = vmatprep.subr.bf16.mxu0 %v1084_v37 }
  0x37   : > { %975 = vmatpush3.bf16.msra.mxu0 %v1084_v37 }
  0xed   : > { %v938_v22 = vpop.f32.mrb[0].mxu0 }
  0xee   : > { %v372_v23 = vadd.f32 %v938_v22, %v869_v21  ;;  %v363_v24 = vpop.f32.mrb[1].mxu0 }
  0xef   : > { %v364_v25 = vadd.f32 %v869_v21, %v363_v24  ;;  %v939_v26 = vpop.f32.mrb[2].mxu0 }
  0xf0   : > { %v375_v27 = vadd.f32 %v939_v26, %v869_v21  ;;  %v366_v28 = vpop.f32.mrb[3].mxu0  ;;  %v380_v30 = vmax.f32 %v372_v23, 0.0 }
  0xf1   : > { %v367_v29 = vadd.f32 %v869_v21, %v366_v28  ;;  %v378_v32 = vmax.f32 %v364_v25, 0.0 }
  0xf2   : > { %v381_v31 = vmax.f32 %v375_v27, 0.0 }
  0xf3   : > { %v379_v33 = vmax.f32 %v367_v29, 0.0 }
  0xf4   : > { %v383_v34 = vpack.c.bf16 %v381_v31, %v380_v30 }
  0xf5   : > { %v382_v35 = vpack.c.bf16 %v379_v33, %v378_v32 }
  0xf7   : > { %956 = vmatprep.mubr.bf16.mxu1 %v382_v35 }
  0xf8   : > { %957 = vmatmul.mubr.bf16.vlgmr.msra.gmra.mrb[0].mxu1 %v383_v34 }
 0x1cb   : > { %v958_v39 = vpop.f32.mrb[0].mxu1 }
 0x1cc   : > { %v498_v40 = vadd.f32 %v958_v39, %v873_v38  ;;  %v489_v41 = vpop.f32.mrb[1].mxu1 }
 0x1cd   : > { %v490_v42 = vadd.f32 %v873_v38, %v489_v41  ;;  %v959_v43 = vpop.f32.mrb[2].mxu1 }
 0x1ce   : > { %v501_v44 = vadd.f32 %v959_v43, %v873_v38  ;;  %v492_v45 = vpop.f32.mrb[3].mxu1  ;;  %v506_v47 = vmax.f32 %v498_v40, 0.0 }
 0x1cf   : > { %v493_v46 = vadd.f32 %v873_v38, %v492_v45  ;;  %v504_v49 = vmax.f32 %v490_v42, 0.0 }
 0x1d0   : > { %v507_v48 = vmax.f32 %v501_v44, 0.0 }
 0x1d1   : > { %v505_v50 = vmax.f32 %v493_v46, 0.0 }
 0x1d2   : > { %v509_v51 = vpack.c.bf16 %v507_v48, %v506_v47 }
 0x1d3   : > { %v508_v52 = vpack.c.bf16 %v505_v50, %v504_v49 }
 0x1d5   : > { %976 = vmatprep.mubr.bf16.mxu0 %v508_v52 }
 0x1d6   : > { %977 = vmatmul.mubr.bf16.vlgmr.msra.gmra.mrb[4].mxu0 %v509_v51 }
 0x2a9   : > { %v978_v54 = vpop.f32.mrb[4].mxu0  ;;  %641 = sbr.rel (!%p1238_p4) target bundleno = 737 (0x2e1), region = 52 }
 0x2aa   : > { %v624_v55 = vadd.f32 %v978_v54, %v882_v53  ;;  %v615_v56 = vpop.f32.mrb[5].mxu0 }
 0x2ab   : > { %v616_v57 = vadd.f32 %v882_v53, %v615_v56  ;;  %v979_v58 = vpop.f32.mrb[6].mxu0 }
 0x2ac   : > { %633 = vst.msk [vmem:[%s1311_s30 + $0x10] sm:$0xff] %vm630_vm1, %v624_v55  ;;  %v627_v59 = vadd.f32 %v979_v58, %v882_v53  ;;  %v618_v60 = vpop.f32.mrb[7].mxu0 }
 0x2ad   : > { %631 = vst.msk [vmem:[%s1311_s30] sm:$0xff] %vm630_vm1, %v616_v57  ;;  %v619_v61 = vadd.f32 %v882_v53, %v618_v60 }
 0x2ae   : > { %634 = vst.msk [vmem:[%s1311_s30 + $0x18] sm:$0xff] %vm630_vm1, %v627_v59 }
 0x2af   : > { %632 = vst.msk [vmem:[%s1311_s30 + $0x8] sm:$0xff] %vm630_vm1, %v619_v61 }
 0x2b0   : > { %s1389_s24 = smov (!%p644_p8, %s643_s24), 4 }
 0x2b1   : > { %s893_s15 = sshll.u32 %s1389_s24, 7 }
 0x2b2   : > { %p896_p9 = scmp.eq.s32.totalorder %s893_s15, 0 }
 0x2b3   : > { %s1330_s16 = sshrl.u32 (!%p896_p9), %s1389_s24, 2 }
 0x2b4   : > { %652 = sbr.rel (%p896_p9) target bundleno = 737 (0x2e1), region = 56  ;;  %p897_p10 = scmp.le.s32.totalorder (!%p896_p9), %s1330_s16, 0 }
 0x2bb   : > { %818 = sbr.rel (%p897_p10) target bundleno = 716 (0x2cc), region = 132  ;;  %s1382_s27 = smov (!%p897_p10), %s1324_s14 }
 0x2bc   : > { %s1383_s9 = smov (!%p897_p10), %s1311_s30  ;;  %s1339_s12 = smov (!%p897_p10), 0  }
 0x2bd   : > { %s1153_s17 = smov (!%p897_p10), 0  }
 0x2c2 LB: >> { %v720_v62 = vld [vmem:[%s1147_s9] sm:$0xff]  ;;  %v722_v63 = vld [vmem:[%s1147_s9 + $0x8] sm:$0xff]  ;;  %v724_v0 = vld [vmem:[%s1147_s9 + $0x10] sm:$0xff]  ;;  %s728_s18 = sadd.s32 1, %s1151_s12  ;;  %s714_s17 = sadd.s32 1, %s1155_s17   ;;  %s1155_s17 = sphi %s1153_s17, %s714_s17   ;;  %s1151_s12 = sphi %s1339_s12, %s1384_s12   ;;  %s1147_s9 = sphi %s1383_s9, %s733_s9   ;;  %s1143_s27 = sphi %s1382_s27, %s734_s27  }
 0x2c3   : >> { %721 = vst [vmem:[%s1143_s27] sm:$0xff] %v720_v62  ;;  %723 = vst [vmem:[%s1143_s27 + $0x8] sm:$0xff] %v722_v63  ;;  %v726_v1 = vld [vmem:[%s1147_s9 + $0x18] sm:$0xff]  ;;  %p729_p11 = scmp.ge.s32.totalorder %s728_s18, %s1330_s16  ;;  %p713_p12 = scmp.ge.s32.totalorder %s714_s17, %s1330_s16 }
 0x2c4   : >> { %725 = vst [vmem:[%s1143_s27 + $0x10] sm:$0xff] %v724_v0  ;;  %727 = vst [vmem:[%s1143_s27 + $0x18] sm:$0xff] %v726_v1 }
 0x2c5   : >> { %s1391_s18 = smov (%p729_p11, %s728_s18), 0  ;;  %716 = sbr.rel (!%p713_p12) target bundleno = 706 (0x2c2), region = 138 }
 0x2c6   : >> { %s898_s19 = sshll.u32 %s1391_s18, 5  ;;  %s1384_s12 = smov %s1391_s18 }
 0x2c7   : >> { %s733_s9 = scalar_lea.vmem %s1311_s30, %s898_s19 [#allocation2]   ;;  %s734_s27 = scalar_lea.vmem %s1324_s14, %s898_s19  }
 0x2cc PF: > { %s1355_s20 = sand.u32 3, %s1389_s24   ;;  %s909_s21 = sshll.u32 %s1330_s16, 5 }
 0x2cd   : > { %s739_s22 = scalar_lea.vmem %s1311_s30, %s909_s21 [#allocation2]   ;;  %s741_s23 = scalar_lea.vmem %s1324_s14, %s909_s21  }
 0x2ce   : > { %p903_p13 = scmp.le.s32.totalorder %s1355_s20, 0 }
 0x2cf   : > { %s1157_s26 = smov (!%p903_p13), %s741_s23   ;;  %s1161_s29 = smov (!%p903_p13), %s739_s22  }
 0x2d0   : > { %832 = sbr.rel (%p903_p13) target bundleno = 737 (0x2e1), region = 143  ;;  %s1165_s10 = smov (!%p903_p13), 0  }
 0x2d1   : > { %s1169_s11 = smov (!%p903_p13), 0  }
 0x2d7 LB: >> { %v751_v2 = vld [vmem:[%s1163_s29] sm:$0xff]  ;;  %s753_s24 = sadd.s32 1, %s1167_s10  ;;  %s745_s11 = sadd.s32 1, %s1171_s11   ;;  %s1171_s11 = sphi %s1169_s11, %s745_s11   ;;  %s1167_s10 = sphi %s1165_s10, %s1166_s10   ;;  %s1163_s29 = sphi %s1161_s29, %s758_s29   ;;  %s1159_s26 = sphi %s1157_s26, %s759_s26  }
 0x2d8   : >> { %752 = vst [vmem:[%s1159_s26] sm:$0xff] %v751_v2  ;;  %p754_p0 = scmp.ge.s32.totalorder %s753_s24, %s1355_s20  ;;  %p744_p1 = scmp.ge.s32.totalorder %s745_s11, %s1355_s20 }
 0x2da   : >> { %s1393_s24 = smov (%p754_p0, %s753_s24), 0  ;;  %747 = sbr.rel (!%p744_p1) target bundleno = 727 (0x2d7), region = 149 }
 0x2db   : >> { %s904_s30 = sshll.u32 %s1393_s24, 3  ;;  %s1166_s10 = smov %s1393_s24  }
 0x2dc   : >> { %s758_s29 = scalar_lea.vmem %s739_s22, %s904_s30 [#allocation2]   ;;  %s759_s26 = scalar_lea.vmem %s741_s23, %s904_s30  }
 0x2e1 PF: > { %p14_p2 = scmp.ge.s32.totalorder %s1228_s28, 4   ;;  %s1385_s24 = smov %s1135_s25 }
 0x2e2   : > { %s1386_s25 = smov %s1236_s8  ;;  %s1387_s26 = smov %s1228_s28 }
 0x2e3   :  { %16 = sbr.rel (!%p14_p2) target bundleno = 2 (0x2), region = 160 }

</bundles_post_ra>
